<compile_context>
chip_gen: v7x
topology: tpu7x:2x2x1
jax: 0.10.0
libtpu: 0.0.40
codegen_flags: <defaults>
</compile_context>

<pallas_src>
import jax
import jax.numpy as jnp
from jax.experimental import pallas as pl
from jax.experimental.pallas import tpu as pltpu


# ----------------------------------------------------------------------------
# Kernel
# ----------------------------------------------------------------------------
def cross_attention_kernel(kv_ref, q_ref, wvo_ref, wr_ref, b_ref, out_ref):
    # softmax over a single key == 1.0 exactly, so attention output == v and
    # the forward reduces to two fused projections + bias (row-wise only).
    acc = jnp.dot(kv_ref[...], wvo_ref[...], preferred_element_type=jnp.float32)
    acc = acc + jnp.dot(q_ref[...], wr_ref[...], preferred_element_type=jnp.float32)
    out_ref[...] = (acc + b_ref[...]).astype(out_ref.dtype)


# ----------------------------------------------------------------------------
# Host-side one-time weight folding
# ----------------------------------------------------------------------------
def fuse_params(params, *, input_dim_q, hidden_dim):
    """Fold Wv@Wo and all biases once (do this per model, not per call)."""
    wvo = params["wv"] @ params["wo"]                       # (Dkv, H)
    if input_dim_q != hidden_dim:
        wr, br = params["wr"], params["br"]
    else:
        # The PyTorch module uses proj_q as the residual branch in this case.
        wr, br = params["wq"], params["bq"]
    b = params["bv"] @ params["wo"] + params["bo"] + br     # (1, H)
    return {"wvo": wvo, "wr": wr, "b": b}


def fused_to_dtype(fused, dtype):
    """Optional: cast fused weights for bf16 activation streaming."""
    return {k: v.astype(dtype) for k, v in fused.items()}


# ----------------------------------------------------------------------------
# Tile sizing (per-generation VMEM aware, lane-padding aware)
# ----------------------------------------------------------------------------
def _pick_batch_tile(itemsize, *, max_tb=8192, vmem_budget_bytes=40 << 20):
    # Each of the 3 streamed arrays (kv, q, out) pads its feature dim to 128
    # lanes in VMEM and is double buffered -> per-row VMEM cost.
    per_row = 3 * 2 * 128 * itemsize            # 3 KiB/row for f32
    tb = min(max_tb, vmem_budget_bytes // per_row)
    tb = max(8, (tb // 8) * 8)                  # respect the (8,128) constraint
    return int(tb)


# ----------------------------------------------------------------------------
# Wrapper
# ----------------------------------------------------------------------------
def cross_attention(q_input, kv_input, fused, *, block_b=None,
                    min_pallas_rows=2048, vmem_limit_bytes=48 << 20):
    assert q_input.ndim == 2 and kv_input.ndim == 2, (
        "CrossAttention collapse assumes seq_len==1 (2-D (B, D) inputs)")
    B, Dq = q_input.shape
    Bk, Dkv = kv_input.shape
    assert B == Bk, "q_input / kv_input batch mismatch"
    H = fused["wvo"].shape[1]
    dtype = q_input.dtype

    # Small-batch fast path: a one-step custom kernel only adds launch +
    # weight-DMA overhead; let XLA fuse the two tiny GEMMs instead.
    if block_b is None and B < min_pallas_rows:
        acc = jnp.dot(kv_input, fused["wvo"], preferred_element_type=jnp.float32)
        acc = acc + jnp.dot(q_input, fused["wr"], preferred_element_type=jnp.float32)
        return (acc + fused["b"]).astype(dtype)

    itemsize = jnp.dtype(dtype).itemsize
    tb = block_b if block_b is not None else _pick_batch_tile(itemsize)
    if B <= tb:
        tb = B                      # full-extent block (exempt from /8 rule)
    grid_b = pl.cdiv(B, tb)         # ragged last block; OOB writes are masked

    w_itemsize = jnp.dtype(fused["wvo"].dtype).itemsize
    cost = pl.CostEstimate(
        flops=2 * B * (Dq + Dkv) * H,
        transcendentals=0,
        bytes_accessed=(itemsize * B * (Dq + Dkv + H)
                        + w_itemsize * ((Dq + Dkv) * H + H)),
    )

    # NOTE: if a trace still shows exposed DMA at block boundaries, bump the
    # activation/out specs to pipeline_mode=pl.Buffered(3) (budget the extra
    # buffer per stream against the VMEM limit).
    return pl.pallas_call(
        cross_attention_kernel,
        out_shape=jax.ShapeDtypeStruct((B, H), dtype),
        grid=(grid_b,),
        in_specs=[
            pl.BlockSpec((tb, Dkv), lambda i: (i, 0)),   # kv activations (streamed)
            pl.BlockSpec((tb, Dq), lambda i: (i, 0)),    # q activations  (streamed)
            pl.BlockSpec((Dkv, H), lambda i: (0, 0)),    # fused Wv@Wo    (resident)
            pl.BlockSpec((Dq, H), lambda i: (0, 0)),     # residual W     (resident)
            pl.BlockSpec((1, H), lambda i: (0, 0)),      # fused bias     (resident)
        ],
        out_specs=pl.BlockSpec((tb, H), lambda i: (i, 0)),
        compiler_params=pltpu.CompilerParams(
            # Batch axis is embarrassingly parallel; splits across v7x's 2 TCs
            # (neutral on single-TC v5e/v6e — tile size / lane density are the
            # real levers there).
            dimension_semantics=("parallel",),
            vmem_limit_bytes=vmem_limit_bytes,
        ),
        cost_estimate=cost,
    )(kv_input, q_input, fused["wvo"], fused["wr"], fused["b"])


# ----------------------------------------------------------------------------
# Parameter init + pure-JAX reference (mirrors the PyTorch forward exactly)
# ----------------------------------------------------------------------------
def init_params(key, input_dim_q, input_dim_kv, hidden_dim):
    """Deterministic synthetic weights; Linear weight stored as (in, out)."""
    def linear(k, fan_in, fan_out):
        kw, kb = jax.random.split(k)
        bound = 1.0 / jnp.sqrt(fan_in)
        w = jax.random.uniform(kw, (fan_in, fan_out), jnp.float32, -bound, bound)
        b = jax.random.uniform(kb, (1, fan_out), jnp.float32, -bound, bound)
        return w, b

    keys = jax.random.split(key, 5)
    wq, bq = linear(keys[0], input_dim_q, hidden_dim)
    wk, bk = linear(keys[1], input_dim_kv, hidden_dim)
    wv, bv = linear(keys[2], input_dim_kv, hidden_dim)
    wo, bo = linear(keys[3], hidden_dim, hidden_dim)
    if input_dim_q != hidden_dim:
        wr, br = linear(keys[4], input_dim_q, hidden_dim)
    else:
        wr, br = wq, bq   # module: residual = proj_q(q_input) when dims match
    return dict(wq=wq, bq=bq, wk=wk, bk=bk, wv=wv, bv=bv,
                wo=wo, bo=bo, wr=wr, br=br)


def reference(q_input, kv_input, p, *, heads, hidden_dim):
    """Full un-simplified forward (projections + scaled softmax attention)."""
    B = q_input.shape[0]
    d = hidden_dim // heads
    scale = d ** (-0.5)
    q = q_input @ p["wq"] + p["bq"]
    k = kv_input @ p["wk"] + p["bk"]
    v = kv_input @ p["wv"] + p["bv"]
    qh = q.reshape(B, heads, 1, d)
    kh = k.reshape(B, heads, 1, d)
    vh = v.reshape(B, heads, 1, d)
    s = jnp.einsum("bhqd,bhkd->bhqk", qh, kh) * scale
    a = jax.nn.softmax(s, axis=-1)
    o = jnp.einsum("bhqk,bhkd->bhqd", a, vh).reshape(B, hidden_dim)
    o = o @ p["wo"] + p["bo"]
    res = q_input @ p["wr"] + p["br"]
    return o + res


# ----------------------------------------------------------------------------
# Demo / correctness check
# ----------------------------------------------------------------------------
if __name__ == "__main__":
    input_dim_q, input_dim_kv, hidden_dim, heads = 16, 24, 32, 4

    key = jax.random.PRNGKey(0)
    k_q, k_kv, k_p, k_q2, k_kv2 = jax.random.split(key, 5)
    params = init_params(k_p, input_dim_q, input_dim_kv, hidden_dim)
    fused = fuse_params(params, input_dim_q=input_dim_q, hidden_dim=hidden_dim)

    # 1) Small-shape check (B=2).  Force the Pallas path (min_pallas_rows=0)
    #    so the kernel itself compiles and runs on the TPU.
    B = 2
    q_input = jax.random.normal(k_q, (B, input_dim_q), jnp.float32)
    kv_input = jax.random.normal(k_kv, (B, input_dim_kv), jnp.float32)
    out = cross_attention(q_input, kv_input, fused, min_pallas_rows=0)
    out = jax.block_until_ready(out)
    ref = reference(q_input, kv_input, params, heads=heads, hidden_dim=hidden_dim)
    assert out.shape == (B, hidden_dim)
    assert jnp.allclose(out, ref, atol=1e-4, rtol=1e-4), (
        float(jnp.max(jnp.abs(out - ref))))

    # 2) Ragged multi-block check (B % tile != 0): exercises the unpadded grid
    #    with masked OOB writes in the last block (no host pad / slice).
    B2 = 300
    q2 = jax.random.normal(k_q2, (B2, input_dim_q), jnp.float32)
    kv2 = jax.random.normal(k_kv2, (B2, input_dim_kv), jnp.float32)
    out2 = jax.block_until_ready(
        cross_attention(q2, kv2, fused, block_b=128, min_pallas_rows=0))
    ref2 = reference(q2, kv2, params, heads=heads, hidden_dim=hidden_dim)
    assert out2.shape == (B2, hidden_dim)
    assert jnp.allclose(out2, ref2, atol=1e-4, rtol=1e-4), (
        float(jnp.max(jnp.abs(out2 - ref2))))

    print("KERNEL_OK")
</pallas_src>

<mosaic_0001>
module attributes {stable_mosaic.version = 11 : i64} {
  func.func @cross_attention_kernel(%arg0: i32, %arg1: memref<2x24xf32, #tpu.memory_space<vmem>>, %arg2: memref<2x16xf32, #tpu.memory_space<vmem>>, %arg3: memref<24x32xf32, #tpu.memory_space<vmem>>, %arg4: memref<16x32xf32, #tpu.memory_space<vmem>>, %arg5: memref<1x32xf32, #tpu.memory_space<vmem>>, %arg6: memref<2x32xf32, #tpu.memory_space<vmem>>) attributes {dimension_semantics = [#tpu.dimension_semantics<parallel>], iteration_bounds = array<i64: 1>, scalar_prefetch = 0 : i64, scratch_operands = 0 : i64, tpu.core_type = #tpu.core_type<tc>, window_params = [{transform_indices = @transform_0, window_bounds = array<i64: 2, 24>}, {transform_indices = @transform_1, window_bounds = array<i64: 2, 16>}, {pipeline_mode = #tpu.pipeline_mode<synchronous>, transform_indices = @transform_2, window_bounds = array<i64: 24, 32>}, {pipeline_mode = #tpu.pipeline_mode<synchronous>, transform_indices = @transform_3, window_bounds = array<i64: 16, 32>}, {pipeline_mode = #tpu.pipeline_mode<synchronous>, transform_indices = @transform_4, window_bounds = array<i64: 1, 32>}, {transform_indices = @transform_5, window_bounds = array<i64: 2, 32>}]} {
    %c0 = arith.constant 0 : index
    %c0_0 = arith.constant 0 : index
    %0 = vector.load %arg1[%c0, %c0_0] : memref<2x24xf32, #tpu.memory_space<vmem>>, vector<2x24xf32>
    %c0_1 = arith.constant 0 : index
    %c0_2 = arith.constant 0 : index
    %1 = vector.load %arg3[%c0_1, %c0_2] : memref<24x32xf32, #tpu.memory_space<vmem>>, vector<24x32xf32>
    %cst = arith.constant dense<0.000000e+00> : vector<2x32xf32>
    %2 = tpu.matmul %0, %1, %cst {dimension_numbers = #tpu.dot_dimension_numbers<[1], [0], [0], [1], [0, 0, 1, 1], [], []>} : vector<2x24xf32>, vector<24x32xf32>, vector<2x32xf32> -> vector<2x32xf32>
    %c0_3 = arith.constant 0 : index
    %c0_4 = arith.constant 0 : index
    %3 = vector.load %arg2[%c0_3, %c0_4] : memref<2x16xf32, #tpu.memory_space<vmem>>, vector<2x16xf32>
    %c0_5 = arith.constant 0 : index
    %c0_6 = arith.constant 0 : index
    %4 = vector.load %arg4[%c0_5, %c0_6] : memref<16x32xf32, #tpu.memory_space<vmem>>, vector<16x32xf32>
    %cst_7 = arith.constant dense<0.000000e+00> : vector<2x32xf32>
    %5 = tpu.matmul %3, %4, %cst_7 {dimension_numbers = #tpu.dot_dimension_numbers<[1], [0], [0], [1], [0, 0, 1, 1], [], []>} : vector<2x16xf32>, vector<16x32xf32>, vector<2x32xf32> -> vector<2x32xf32>
    %6 = arith.addf %2, %5 : vector<2x32xf32>
    %c0_8 = arith.constant 0 : index
    %c0_9 = arith.constant 0 : index
    %7 = vector.load %arg5[%c0_8, %c0_9] : memref<1x32xf32, #tpu.memory_space<vmem>>, vector<1x32xf32>
    %8 = vector.broadcast %7 : vector<1x32xf32> to vector<2x32xf32>
    %9 = arith.addf %6, %8 : vector<2x32xf32>
    %c0_10 = arith.constant 0 : index
    %c0_11 = arith.constant 0 : index
    %10 = vector.load %arg6[%c0_10, %c0_11] : memref<2x32xf32, #tpu.memory_space<vmem>>, vector<2x32xf32>
    tpu.vector_store %arg6[%c0_10, %c0_11], %9 {strides = array<i32>} : memref<2x32xf32, #tpu.memory_space<vmem>>, vector<2x32xf32>,
    return
  }
  func.func @transform_0(%arg0: i32) -> (i32, i32) {
    %c0_i32 = arith.constant 0 : i32
    %c0_i32_0 = arith.constant 0 : i32
    return %arg0, %c0_i32 : i32, i32
  }
  func.func @transform_1(%arg0: i32) -> (i32, i32) {
    %c0_i32 = arith.constant 0 : i32
    %c0_i32_0 = arith.constant 0 : i32
    return %arg0, %c0_i32 : i32, i32
  }
  func.func @transform_2(%arg0: i32) -> (i32, i32) {
    %c0_i32 = arith.constant 0 : i32
    %c0_i32_0 = arith.constant 0 : i32
    %c0_i32_1 = arith.constant 0 : i32
    return %c0_i32, %c0_i32_0 : i32, i32
  }
  func.func @transform_3(%arg0: i32) -> (i32, i32) {
    %c0_i32 = arith.constant 0 : i32
    %c0_i32_0 = arith.constant 0 : i32
    %c0_i32_1 = arith.constant 0 : i32
    return %c0_i32, %c0_i32_0 : i32, i32
  }
  func.func @transform_4(%arg0: i32) -> (i32, i32) {
    %c0_i32 = arith.constant 0 : i32
    %c0_i32_0 = arith.constant 0 : i32
    %c0_i32_1 = arith.constant 0 : i32
    return %c0_i32, %c0_i32_0 : i32, i32
  }
  func.func @transform_5(%arg0: i32) -> (i32, i32) {
    %c0_i32 = arith.constant 0 : i32
    %c0_i32_0 = arith.constant 0 : i32
    return %arg0, %c0_i32 : i32, i32
  }
}

</mosaic_0001>

<bundles_post_ra>
// kernel: tpu_custom_call.1
= control target key start
LH: loop header
LB: loop body
LE: loop exit
PB: predicated region body
PF: predicated region fallthrough
CT: control target
= control target key end

     0   :  { %10 = vsyncpa [#allocation3], 0  ;;  %s475_s0 = inlined_call_operand.hbm [shape: f32[2,24], index: 0, kind: input, shape index: {}]   ;;  %s476_s1 = inlined_call_operand.vmem [shape: f32[2,16], index: 1, kind: input, shape index: {}]   ;;  %s477_s2 = inlined_call_operand.hbm [shape: f32[24,32], index: 2, kind: input, shape index: {}]   ;;  %s478_s3 = inlined_call_operand.hbm [shape: f32[16,32], index: 3, kind: input, shape index: {}]   ;;  %s479_s4 = inlined_call_operand.vmem [shape: f32[1,32], index: 4, kind: input, shape index: {}]   ;;  %s480_s5 = inlined_call_operand.hbm [shape: f32[2,32], index: 5, kind: output, shape index: {}]  }
   0x1   :  { %11 = vsyncpa [#allocation6], 0 }
   0x2   :  { %12 = vsyncpa [#allocation4], 0  ;;  %s376_s18 = smov [#allocation5]   ;;  %s282_s22 = scalar_lea.hbm %s477_s2, 384 }
   0x3   :  { %s30_s19 = sshll.u32 %s376_s18, 4  ;;  %p283_p0 = scmp.ne.s32.totalorder %s477_s2, %s282_s22  ;;  %s31_s19 = int_to_ptr.vmem [resolvable:$true] %s30_s19 }
   0x4   :  { %p286_p1 = scmp.lt.u32.totalorder %s282_s22, %s477_s2 }
   0x6   :  { %p288_p2 = pnand %p286_p1, %p283_p0 }
   0x8   :  { %291 = shalt.err (!%p288_p2)
}
   0x9   :  { %s292_s27 = scalar_lea.vmem %s31_s19, 384  ;;  %p297_p4 = scmp.lt.s32.totalorder %s31_s19, %s31_s19 }
   0xa   :  { %p293_p3 = scmp.ne.s32.totalorder %s31_s19, %s292_s27  ;;  %p298_p5 = scmp.lt.s32.totalorder %s292_s27, %s292_s27 }
   0xc   :  { %p299_p6 = por %p298_p5, %p297_p4 }
   0xe   :  { %p300_p7 = pnand %p299_p6, %p293_p3 }
  0x10   :  { %303 = shalt.err (!%p300_p7)
}
  0x11   :  { %s377_s28 = smov 128   ;;  %s378_s29 = smov 8  }
  0x12   :  { %36 = dma.hbm_to_vmem [thread:$0]  %s477_s2, 384, %s31_s19, [#allocation6], %s377_s28, %s377_s28, %s378_s29  }
  0x13   :  { %s379_s7 = smov [#allocation2]   ;;  %s380_s9 = smov [#allocation7]  }
  0x14   :  { %s19_s8 = sshll.u32 %s379_s7, 4  ;;  %s42_s10 = sshll.u32 %s380_s9, 4  ;;  %s20_s8 = int_to_ptr.vmem [resolvable:$true] %s19_s8  ;;  %s43_s10 = int_to_ptr.vmem [resolvable:$true] %s42_s10 }
  0x15   :  { %s304_s13 = scalar_lea.hbm %s475_s0, 32 }
  0x16   :  { %p305_p8 = scmp.ne.s32.totalorder %s475_s0, %s304_s13  ;;  %p308_p9 = scmp.lt.u32.totalorder %s304_s13, %s475_s0 }
  0x18   :  { %p310_p10 = pnand %p308_p9, %p305_p8 }
  0x1a   :  { %313 = shalt.err (!%p310_p10)
}
  0x1b   :  { %s314_s2 = scalar_lea.vmem %s20_s8, 32  ;;  %p319_p12 = scmp.lt.s32.totalorder %s20_s8, %s20_s8 }
  0x1c   :  { %p315_p11 = scmp.ne.s32.totalorder %s20_s8, %s314_s2  ;;  %p320_p13 = scmp.lt.s32.totalorder %s314_s2, %s314_s2 }
  0x1e   :  { %p321_p0 = por %p320_p13, %p319_p12 }
  0x20   :  { %p322_p1 = pnand %p321_p0, %p315_p11 }
  0x22   :  { %325 = shalt.err (!%p322_p1)
}
  0x23   :  { %22 = dma.hbm_to_vmem [thread:$0]  %s475_s0, 32, %s20_s8, [#allocation3]  }
  0x24   :  { %s326_s22 = scalar_lea.hbm %s478_s3, 256 }
  0x25   :  { %p327_p2 = scmp.ne.s32.totalorder %s478_s3, %s326_s22  ;;  %p330_p3 = scmp.lt.u32.totalorder %s326_s22, %s478_s3 }
  0x27   :  { %p332_p4 = pnand %p330_p3, %p327_p2 }
  0x29   :  { %335 = shalt.err (!%p332_p4)
}
  0x2a   :  { %s336_s27 = scalar_lea.vmem %s43_s10, 256  ;;  %p341_p6 = scmp.lt.s32.totalorder %s43_s10, %s43_s10 }
  0x2b   :  { %p337_p5 = scmp.ne.s32.totalorder %s43_s10, %s336_s27  ;;  %p342_p7 = scmp.lt.s32.totalorder %s336_s27, %s336_s27 }
  0x2d   :  { %p343_p8 = por %p342_p7, %p341_p6 }
  0x2f   :  { %p344_p9 = pnand %p343_p8, %p337_p5 }
  0x31   :  { %347 = shalt.err (!%p344_p9)
}
  0x32   :  { %48 = dma.hbm_to_vmem [thread:$0]  %s478_s3, 256, %s43_s10, [#allocation6], %s377_s28, %s377_s28, %s378_s29  }
  0x33   :  { %370 = dma.done.wait [#allocation3], 32  }
  0x34   :  { %371 = vsyncadd [#allocation3], 4294967264 }
  0x35   :  { %372 = dma.done.wait [#allocation6], 640  }
  0x36   :  { %373 = vsyncadd [#allocation6], 4294966656  ;;  %v381_v0 = vmov 0.0|0.0   ;;  %vm382_vm0 = vmmov 0   ;;  %v383_v1 = vmov 0.0   ;;  %v61_v2 = vld [vmem:[#allocation5] sm:$0xff] }
  0x37   :  { %270 = vmatprep.subr.bf16.mxu1 %v381_v0  ;;  %267 = vmatprep.subr.bf16.mxu0 %v381_v0  ;;  %v62_v3 = vld [vmem:[#allocation5 + $0x8] sm:$0xff]  ;;  %v65_v4 = vld [vmem:[#allocation7] sm:$0xff]  ;;  %v66_v6 = vld [vmem:[#allocation7 + $0x8] sm:$0xff]  ;;  %vm67_vm1 = vcmask 130048   ;;  %vm141_vm2 = vcmask 195584   ;;  %s384_s7 = smov [#allocation8]  }
  0x38   :  { %255 = vmatprep.mubr.msk.f32.mxu0 %vm382_vm0, %v383_v1  ;;  %264 = vmatprep.mubr.msk.f32.mxu1 %vm382_vm0, %v383_v1  ;;  %v271_v5 = vpack.c.bf16 %v62_v3, %v61_v2  ;;  %v268_v7 = vpack.c.bf16 %v66_v6, %v65_v4  ;;  %v64_v8 = vld [vmem:[%s476_s1] sm:$0x3]  ;;  %v63_v9 = vld [vmem:[#allocation5 + $0x10] sm:$0xff]  ;;  %s231_s8 = sshll.u32 %s384_s7, 4  ;;  %vm223_vm3 = vcmask 254976   ;;  %s232_s8 = int_to_ptr.vmem [resolvable:$true] %s231_s8 }
  0x39   :  { %v60_v10 = vld [vmem:[#allocation2] sm:$0x3]  ;;  %s348_s1 = scalar_lea.vmem %s232_s8, 32  ;;  %p353_p11 = scmp.lt.s32.totalorder %s232_s8, %s232_s8 }
  0x3a   :  { %272 = vmatpush3.bf16.msra.mxu1 %v271_v5  ;;  %269 = vmatpush3.bf16.msra.mxu0 %v268_v7  ;;  %v243_v14 = vld [vmem:[%s479_s4] ss:$0 sm:$0xff]  ;;  %p349_p10 = scmp.ne.s32.totalorder %s232_s8, %s348_s1  ;;  %p354_p12 = scmp.lt.s32.totalorder %s348_s1, %s348_s1 }
  0x3b   :  { %262 = vmatprep.subr.mxu1 %v383_v1 }
  0x3c   :  { %p355_p13 = por %p354_p12, %p353_p11 }
  0x3d   :  { %256 = vmatmul.mubr.msk.f32.vlgmr.msra.gmra.mrb[0].mxu0 %vm67_vm1, %v64_v8 }
  0x3e   :  { %263 = vmatpush3.msra.mxu1 %v63_v9  ;;  %p356_p0 = pnand %p355_p13, %p349_p10 }
  0x3f   :  { %265 = vmatmul.mubr.msk.f32.vlgmr.msra.gmra.mrb[0].mxu1 %vm141_vm2, %v60_v10 }
 0x110   :  { %v137_v11 = vpop.f32.mrb[0].mxu0 }
 0x111   :  { %v257_v12 = vpop.f32.mrb[1].mxu0 }
 0x112   :  { %v211_v13 = vpop.f32.mrb[0].mxu1 }
 0x113   :  { %v212_v15 = vadd.f32 %v211_v13, %v137_v11  ;;  %v266_v16 = vpop.f32.mrb[1].mxu1 }
 0x115   :  { %v222_v17 = vadd.f32 %v243_v14, %v212_v15 }
 0x117   :  { %224 = vst.msk [vmem:[#allocation8] sm:$0x3] %vm223_vm3, %v222_v17 }
 0x118   :  { %359 = shalt.err (!%p356_p0)
}
 0x119   :  { %s360_s11 = scalar_lea.hbm %s480_s5, 32 }
 0x11a   :  { %p361_p1 = scmp.ne.s32.totalorder %s480_s5, %s360_s11  ;;  %p364_p2 = scmp.lt.u32.totalorder %s360_s11, %s480_s5 }
 0x11c   :  { %p366_p3 = pnand %p364_p2, %p361_p1 }
 0x11e   :  { %369 = shalt.err (!%p366_p3)
}
 0x11f   :  { %234 = dma.vmem_to_hbm [thread:$0]  %s232_s8, 32, %s480_s5, [#allocation4]  }
 0x120   :  { %374 = dma.done.wait [#allocation4], 32  }
 0x121   :  { %375 = vsyncadd [#allocation4], 4294967264 }
 0x122   :  { %238 = vsyncpa [#allocation3], 1 }
 0x123   :  { %239 = vsyncpa [#allocation6], 1 }
 0x124   :  { %240 = vsyncpa [#allocation4], 1 }

</bundles_post_ra>
